<compile_context>
chip_gen: v6e
topology: v6e:2x2x1
jax: 0.10.0
libtpu: 0.0.40
codegen_flags: <defaults>
</compile_context>

<pallas_src>
import functools

import jax
import jax.numpy as jnp
from jax import lax
from jax.experimental import pallas as pl
from jax.experimental.pallas import tpu as pltpu


def _avg_smooth_kernel(x_ref, o_ref, *, K, Ho, Wo, inv_k2):
    """One lane-block slab per grid step.

    x_ref: (H, W, L_blk)   input slab; spatial dims leading, (N*C) in lanes
    o_ref: (Ho, Wo, L_blk) output slab
    """
    x = x_ref[...].astype(jnp.float32)          # f32 accumulation

    # Separable box filter.
    # Vertical Kx1 sum: H is the leading (untiled) axis -> slices are free
    # address offsets.
    v = x[0:Ho]
    for kh in range(1, K):
        v = v + x[kh:kh + Ho]
    # Horizontal 1xK sum: shifts along W (sublane axis) on the reduced slab.
    h = v[:, 0:Wo, :]
    for kw in range(1, K):
        h = h + v[:, kw:kw + Wo, :]

    # Single scale by 1/K^2 (all taps of the module's weight are equal).
    o_ref[...] = (h * jnp.float32(inv_k2)).astype(o_ref.dtype)


def _pick_lane_block(L, H, W, itemsize, budget_bytes=2 << 20):
    """Largest lane block whose input slab fits a per-buffer VMEM budget.

    Prefers lane-aligned blocks (multiples of 128 dividing L); the block-shape
    rule requires the last dim to be a multiple of 128 or the full extent.
    """
    if H * W * L * itemsize <= budget_bytes:
        return L
    best = None
    for blk in range(128, L, 128):
        if L % blk == 0 and H * W * blk * itemsize <= budget_bytes:
            best = blk
    # TODO(synk): if no lane-aligned block fits (huge H*W with awkward N*C),
    # spatial H tiling with a K-1 halo would be needed; fall back to full L.
    return best if best is not None else L


def average_smoothing(x, kernel_size):
    """Depthwise KxK average smoothing (stride 1, VALID), matching AverageSmoothing.

    x: (N, C, H, W) -> (N, C, H-K+1, W-K+1).
    The module's weight buffer is the constant 1/K^2 box kernel, so it is
    folded into a single compile-time scale instead of being a kernel input.
    """
    N, C, H, W = x.shape
    K = int(kernel_size)
    Ho, Wo = H - K + 1, W - K + 1
    assert Ho >= 1 and Wo >= 1

    # Layout plumbing: fold (N, C) into one lane-dense trailing axis.
    L = N * C
    x_hwl = jnp.transpose(x, (2, 3, 0, 1)).reshape(H, W, L)   # (H, W, N*C)

    l_blk = _pick_lane_block(L, H, W, x.dtype.itemsize)
    num_l_blocks = pl.cdiv(L, l_blk)

    kernel = functools.partial(
        _avg_smooth_kernel, K=K, Ho=Ho, Wo=Wo, inv_k2=1.0 / (K * K))

    out_hwl = pl.pallas_call(
        kernel,
        out_shape=jax.ShapeDtypeStruct((Ho, Wo, L), x.dtype),
        grid_spec=pltpu.PrefetchScalarGridSpec(
            num_scalar_prefetch=0,
            grid=(num_l_blocks,),
            in_specs=[pl.BlockSpec((H, W, l_blk), lambda l: (0, 0, l))],
            out_specs=pl.BlockSpec((Ho, Wo, l_blk), lambda l: (0, 0, l)),
        ),
        compiler_params=pltpu.CompilerParams(
            dimension_semantics=("parallel",),
            vmem_limit_bytes=32 * 1024 * 1024,
        ),
    )(x_hwl)

    # Back to NCHW.
    return jnp.transpose(out_hwl.reshape(Ho, Wo, N, C), (2, 3, 0, 1))


def make_average_weight(channels, kernel_size, dtype=jnp.float32):
    """The PyTorch module's buffer (C,1,K,K) of 1/K^2 — used only for the reference check."""
    k = jnp.ones((kernel_size, kernel_size), dtype) / (kernel_size * kernel_size)
    return jnp.tile(k.reshape(1, 1, kernel_size, kernel_size), (channels, 1, 1, 1))


# TODO(synk): dim=1 (conv1d) and dim=3 (conv3d) variants of AverageSmoothing are not implemented; 2-D spatial only.


if __name__ == "__main__":
    N, C, H, W = 2, 4, 16, 16
    K = 3

    key = jax.random.PRNGKey(0)
    x = jax.random.normal(key, (N, C, H, W), dtype=jnp.float32)

    out = jax.block_until_ready(average_smoothing(x, K))

    # Pure-JAX reference: depthwise (grouped) conv, VALID padding, stride 1,
    # using the module's actual weight buffer.
    weight = make_average_weight(C, K, dtype=jnp.float32)
    ref = lax.conv_general_dilated(
        x, weight,
        window_strides=(1, 1), padding="VALID",
        dimension_numbers=("NCHW", "OIHW", "NCHW"),
        feature_group_count=C)

    assert out.shape == (N, C, H - K + 1, W - K + 1)
    assert jnp.allclose(out, ref, atol=1e-5, rtol=1e-5)

    print("KERNEL_OK")
</pallas_src>

<mosaic_0001>
module attributes {stable_mosaic.version = 11 : i64} {
  func.func @_avg_smooth_kernel(%arg0: i32, %arg1: memref<16x16x8xf32, #tpu.memory_space<vmem>>, %arg2: memref<14x14x8xf32, #tpu.memory_space<vmem>>) attributes {dimension_semantics = [#tpu.dimension_semantics<parallel>], iteration_bounds = array<i64: 1>, scalar_prefetch = 0 : i64, scratch_operands = 0 : i64, tpu.core_type = #tpu.core_type<tc>, window_params = [{transform_indices = @transform_0, window_bounds = array<i64: 16, 16, 8>}, {transform_indices = @transform_1, window_bounds = array<i64: 14, 14, 8>}]} {
    %c0 = arith.constant 0 : index
    %c0_0 = arith.constant 0 : index
    %c0_1 = arith.constant 0 : index
    %0 = vector.load %arg1[%c0, %c0_0, %c0_1] : memref<16x16x8xf32, #tpu.memory_space<vmem>>, vector<16x16x8xf32>
    %1 = vector.extract_strided_slice %0 {offsets = [0, 0, 0], sizes = [14, 16, 8], strides = [1, 1, 1]} : vector<16x16x8xf32> to vector<14x16x8xf32>
    %2 = vector.extract_strided_slice %0 {offsets = [1, 0, 0], sizes = [14, 16, 8], strides = [1, 1, 1]} : vector<16x16x8xf32> to vector<14x16x8xf32>
    %3 = arith.addf %1, %2 : vector<14x16x8xf32>
    %4 = vector.extract_strided_slice %0 {offsets = [2, 0, 0], sizes = [14, 16, 8], strides = [1, 1, 1]} : vector<16x16x8xf32> to vector<14x16x8xf32>
    %5 = arith.addf %3, %4 : vector<14x16x8xf32>
    %6 = vector.extract_strided_slice %5 {offsets = [0, 0, 0], sizes = [14, 14, 8], strides = [1, 1, 1]} : vector<14x16x8xf32> to vector<14x14x8xf32>
    %7 = vector.extract_strided_slice %5 {offsets = [0, 1, 0], sizes = [14, 14, 8], strides = [1, 1, 1]} : vector<14x16x8xf32> to vector<14x14x8xf32>
    %8 = arith.addf %6, %7 : vector<14x14x8xf32>
    %9 = vector.extract_strided_slice %5 {offsets = [0, 2, 0], sizes = [14, 14, 8], strides = [1, 1, 1]} : vector<14x16x8xf32> to vector<14x14x8xf32>
    %10 = arith.addf %8, %9 : vector<14x14x8xf32>
    %cst = arith.constant 0.111111112 : f32
    %11 = vector.broadcast %cst : f32 to vector<14x14x8xf32>
    %12 = arith.mulf %10, %11 : vector<14x14x8xf32>
    %c0_2 = arith.constant 0 : index
    %c0_3 = arith.constant 0 : index
    %c0_4 = arith.constant 0 : index
    %13 = vector.load %arg2[%c0_2, %c0_3, %c0_4] : memref<14x14x8xf32, #tpu.memory_space<vmem>>, vector<14x14x8xf32>
    tpu.vector_store %arg2[%c0_2, %c0_3, %c0_4], %12 {strides = array<i32>} : memref<14x14x8xf32, #tpu.memory_space<vmem>>, vector<14x14x8xf32>,
    return
  }
  func.func @transform_0(%arg0: i32) -> (i32, i32, i32) {
    %c0_i32 = arith.constant 0 : i32
    %c0_i32_0 = arith.constant 0 : i32
    %c0_i32_1 = arith.constant 0 : i32
    return %c0_i32, %c0_i32_0, %arg0 : i32, i32, i32
  }
  func.func @transform_1(%arg0: i32) -> (i32, i32, i32) {
    %c0_i32 = arith.constant 0 : i32
    %c0_i32_0 = arith.constant 0 : i32
    %c0_i32_1 = arith.constant 0 : i32
    return %c0_i32, %c0_i32_0, %arg0 : i32, i32, i32
  }
}

</mosaic_0001>

<bundles_post_ra>
// kernel: tpu_custom_call.1
= control target key start
LH: loop header
LB: loop body
LE: loop exit
PB: predicated region body
PF: predicated region fallthrough
CT: control target
= control target key end

     0   :  { %vm124_vm0 = vcmask 1046528   ;;  %vm223_vm1 = vcmask 1045504   ;;  %vm352_vm2 = vcmask 62464   ;;  %vm350_vm3 = vcmask 64512   ;;  %s635_s0 = inlined_call_operand.vmem [shape: f32[16,16,8], index: 0, kind: input, shape index: {}]   ;;  %s636_s1 = inlined_call_operand.vmem [shape: f32[14,14,8], index: 1, kind: output, shape index: {}]  }
   0x1   :  { %v8_v0 = vld [vmem:[%s635_s0] sm:$0xff]  ;;  %v9_v1 = vld [vmem:[%s635_s0 + $0x8] sm:$0xff]  ;;  %v10_v2 = vld [vmem:[%s635_s0 + $0x10] sm:$0xff] }
   0x2   :  { %v11_v3 = vld [vmem:[%s635_s0 + $0x18] sm:$0xff]  ;;  %v12_v4 = vld [vmem:[%s635_s0 + $0x20] sm:$0xff]  ;;  %v13_v5 = vld [vmem:[%s635_s0 + $0x28] sm:$0xff]  ;;  %v40_v6 = vadd.f32 %v10_v2, %v8_v0 }
   0x3   :  { %v41_v7 = vadd.f32 %v11_v3, %v9_v1  ;;  %v14_v8 = vld [vmem:[%s635_s0 + $0x30] sm:$0xff]  ;;  %v15_v9 = vld [vmem:[%s635_s0 + $0x38] sm:$0xff]  ;;  %v42_v10 = vadd.f32 %v12_v4, %v10_v2  ;;  %v43_v11 = vadd.f32 %v13_v5, %v11_v3  ;;  %v421_v12 = vld [vmem:[%s635_s0 + $0x40] sm:$0xff] }
   0x4   :  { %v68_v13 = vadd.f32 %v40_v6, %v12_v4  ;;  %v17_v14 = vld [vmem:[%s635_s0 + $0x48] sm:$0xff]  ;;  %v44_v15 = vadd.f32 %v14_v8, %v12_v4  ;;  %v45_v16 = vadd.f32 %v15_v9, %v13_v5  ;;  %v46_v17 = vadd.f32 %v421_v12, %v14_v8  ;;  %v18_v50 = vld [vmem:[%s635_s0 + $0x50] sm:$0xff]  ;;  %v19_v54 = vld [vmem:[%s635_s0 + $0x58] sm:$0xff] }
   0x5   :  { %v69_v18 = vadd.f32 %v41_v7, %v13_v5  ;;  %v70_v19 = vadd.f32 %v42_v10, %v14_v8  ;;  %v71_v20 = vadd.f32 %v43_v11, %v15_v9  ;;  %v47_v21 = vadd.f32 %v17_v14, %v15_v9  ;;  %v20_v56 = vld [vmem:[%s635_s0 + $0x60] sm:$0xff]  ;;  %v21_v57 = vld [vmem:[%s635_s0 + $0x68] sm:$0xff]  ;;  %v22_v2 = vld [vmem:[%s635_s0 + $0x70] sm:$0xff] }
   0x6   :  { %v125_v22 = vrot.slane %v68_v13, 1  ;;  %v224_v23 = vrot.slane %v68_v13, 2  ;;  %v72_v24 = vadd.f32 %v44_v15, %v421_v12  ;;  %v73_v25 = vadd.f32 %v45_v16, %v17_v14  ;;  %v23_v15 = vld [vmem:[%s635_s0 + $0x78] sm:$0xff] }
   0x7   :  { %v126_v26 = vrot.slane %v69_v18, 1  ;;  %v225_v27 = vrot.slane %v69_v18, 2  ;;  %v128_v28 = vrot.slane %v70_v19, 1  ;;  %v129_v29 = vrot.slane %v71_v20, 1 }
   0x8   :  { %v227_v30 = vrot.slane %v70_v19, 2  ;;  %v228_v31 = vrot.slane %v71_v20, 2  ;;  %v131_v32 = vrot.slane %v72_v24, 1  ;;  %v132_v33 = vrot.slane %v73_v25, 1 }
   0x9   :  { %v127_v34 = vsel %vm124_vm0, %v125_v22, %v126_v26  ;;  %v226_v35 = vsel %vm223_vm1, %v224_v23, %v225_v27  ;;  %v196_v36 = vadd.f32 %v126_v26, %v69_v18  ;;  %v130_v37 = vsel %vm124_vm0, %v128_v28, %v129_v29 }
   0xa   :  { %v195_v38 = vadd.f32 %v127_v34, %v68_v13  ;;  %v197_v39 = vadd.f32 %v130_v37, %v70_v19  ;;  %v229_v40 = vsel %vm223_vm1, %v227_v30, %v228_v31  ;;  %v198_v41 = vadd.f32 %v129_v29, %v71_v20  ;;  %v25_v37 = vld [vmem:[%s635_s0 + $0x88] sm:$0xff] }
   0xb   :  { %v295_v42 = vadd.f32 %v225_v27, %v196_v36  ;;  %v133_v43 = vsel %vm124_vm0, %v131_v32, %v132_v33  ;;  %v230_v44 = vrot.slane %v72_v24, 2  ;;  %v231_v45 = vrot.slane %v73_v25, 2  ;;  %v24_v36 = vld [vmem:[%s635_s0 + $0x80] sm:$0xff] }
   0xc   :  { %v294_v46 = vadd.f32 %v226_v35, %v195_v38  ;;  %v296_v47 = vadd.f32 %v229_v40, %v197_v39  ;;  %v297_v48 = vadd.f32 %v228_v31, %v198_v41  ;;  %v199_v49 = vadd.f32 %v133_v43, %v72_v24 }
   0xd   :  { %v323_v51 = vmul.f32 0.11111111, %v295_v42  ;;  %v232_v52 = vsel %vm223_vm1, %v230_v44, %v231_v45  ;;  %v200_v53 = vadd.f32 %v132_v33, %v73_v25  ;;  %v74_v55 = vadd.f32 %v46_v17, %v18_v50 }
   0xe   :  { %v322_v58 = vmul.f32 0.11111111, %v294_v46  ;;  %v324_v59 = vmul.f32 0.11111111, %v296_v47  ;;  %v325_v60 = vmul.f32 0.11111111, %v297_v48  ;;  %v298_v61 = vadd.f32 %v232_v52, %v199_v49 }
   0xf   :  { %353 = vst.msk [vmem:[%s636_s1 + $0x8] sm:$0x3f] %vm352_vm2, %v323_v51  ;;  %v299_v62 = vadd.f32 %v231_v45, %v200_v53  ;;  %v75_v63 = vadd.f32 %v47_v21, %v19_v54  ;;  %v134_v0 = vrot.slane %v74_v55, 1  ;;  %v233_v1 = vrot.slane %v74_v55, 2 }
  0x10   :  { %351 = vst.msk [vmem:[%s636_s1] sm:$0xff] %vm350_vm3, %v322_v58  ;;  %354 = vst.msk [vmem:[%s636_s1 + $0x10] sm:$0xff] %vm350_vm3, %v324_v59  ;;  %v326_v3 = vmul.f32 0.11111111, %v298_v61  ;;  %v48_v4 = vadd.f32 %v18_v50, %v421_v12  ;;  %v49_v5 = vadd.f32 %v19_v54, %v17_v14  ;;  %v50_v6 = vadd.f32 %v20_v56, %v18_v50 }
  0x11   :  { %355 = vst.msk [vmem:[%s636_s1 + $0x18] sm:$0x3f] %vm352_vm2, %v325_v60  ;;  %v327_v7 = vmul.f32 0.11111111, %v299_v62  ;;  %v135_v8 = vrot.slane %v75_v63, 1  ;;  %v234_v9 = vrot.slane %v75_v63, 2  ;;  %v51_v10 = vadd.f32 %v21_v57, %v19_v54 }
  0x12   :  { %356 = vst.msk [vmem:[%s636_s1 + $0x20] sm:$0xff] %vm350_vm3, %v326_v3  ;;  %v76_v11 = vadd.f32 %v48_v4, %v20_v56  ;;  %v77_v13 = vadd.f32 %v49_v5, %v21_v57  ;;  %v78_v16 = vadd.f32 %v50_v6, %v22_v2  ;;  %v52_v17 = vadd.f32 %v22_v2, %v20_v56  ;;  %v26_v54 = vld [vmem:[%s635_s0 + $0x90] sm:$0xff] }
  0x13   :  { %357 = vst.msk [vmem:[%s636_s1 + $0x28] sm:$0x3f] %vm352_vm2, %v327_v7  ;;  %v136_v12 = vsel %vm124_vm0, %v134_v0, %v135_v8  ;;  %v235_v14 = vsel %vm223_vm1, %v233_v1, %v234_v9  ;;  %v202_v18 = vadd.f32 %v135_v8, %v75_v63  ;;  %v79_v19 = vadd.f32 %v51_v10, %v23_v15  ;;  %v28_v7 = vld [vmem:[%s635_s0 + $0xa0] sm:$0xff]  ;;  %v29_v8 = vld [vmem:[%s635_s0 + $0xa8] sm:$0xff] }
  0x14   :  { %v201_v20 = vadd.f32 %v136_v12, %v74_v55  ;;  %v137_v21 = vrot.slane %v76_v11, 1  ;;  %v138_v22 = vrot.slane %v77_v13, 1  ;;  %v236_v23 = vrot.slane %v76_v11, 2  ;;  %v27_v55 = vld [vmem:[%s635_s0 + $0x98] sm:$0xff] }
  0x15   :  { %v301_v24 = vadd.f32 %v234_v9, %v202_v18  ;;  %v237_v25 = vrot.slane %v77_v13, 2  ;;  %v140_v26 = vrot.slane %v78_v16, 1  ;;  %v141_v27 = vrot.slane %v79_v19, 1 }
  0x16   :  { %v300_v28 = vadd.f32 %v235_v14, %v201_v20  ;;  %v139_v29 = vsel %vm124_vm0, %v137_v21, %v138_v22  ;;  %v204_v30 = vadd.f32 %v138_v22, %v77_v13  ;;  %v239_v31 = vrot.slane %v78_v16, 2 }
  0x17   :  { %v329_v32 = vmul.f32 0.11111111, %v301_v24  ;;  %v203_v33 = vadd.f32 %v139_v29, %v76_v11  ;;  %v238_v34 = vsel %vm223_vm1, %v236_v23, %v237_v25  ;;  %v142_v35 = vsel %vm124_vm0, %v140_v26, %v141_v27  ;;  %v30_v26 = vld [vmem:[%s635_s0 + $0xb0] sm:$0xff] }
  0x18   :  { %v328_v38 = vmul.f32 0.11111111, %v300_v28  ;;  %v303_v39 = vadd.f32 %v237_v25, %v204_v30  ;;  %v205_v40 = vadd.f32 %v142_v35, %v78_v16  ;;  %v240_v41 = vrot.slane %v79_v19, 2 }
  0x19   :  { %359 = vst.msk [vmem:[%s636_s1 + $0x38] sm:$0x3f] %vm352_vm2, %v329_v32  ;;  %v302_v42 = vadd.f32 %v238_v34, %v203_v33  ;;  %v206_v43 = vadd.f32 %v141_v27, %v79_v19  ;;  %v53_v44 = vadd.f32 %v23_v15, %v21_v57  ;;  %v80_v45 = vadd.f32 %v52_v17, %v24_v36  ;;  %v31_v27 = vld [vmem:[%s635_s0 + $0xb8] sm:$0xff] }
  0x1a   :  { %358 = vst.msk [vmem:[%s636_s1 + $0x30] sm:$0xff] %vm350_vm3, %v328_v38  ;;  %v331_v46 = vmul.f32 0.11111111, %v303_v39  ;;  %v241_v47 = vsel %vm223_vm1, %v239_v31, %v240_v41  ;;  %v54_v48 = vadd.f32 %v24_v36, %v22_v2  ;;  %v55_v49 = vadd.f32 %v25_v37, %v23_v15  ;;  %v32_v38 = vld [vmem:[%s635_s0 + $0xc0] sm:$0xff] }
  0x1b   :  { %v330_v50 = vmul.f32 0.11111111, %v302_v42  ;;  %v304_v51 = vadd.f32 %v241_v47, %v205_v40  ;;  %v305_v52 = vadd.f32 %v240_v41, %v206_v43  ;;  %v81_v53 = vadd.f32 %v53_v44, %v25_v37 }
  0x1c   :  { %361 = vst.msk [vmem:[%s636_s1 + $0x48] sm:$0x3f] %vm352_vm2, %v331_v46  ;;  %v143_v56 = vrot.slane %v80_v45, 1  ;;  %v242_v57 = vrot.slane %v80_v45, 2  ;;  %v82_v58 = vadd.f32 %v54_v48, %v26_v54  ;;  %v83_v59 = vadd.f32 %v55_v49, %v27_v55 }
  0x1d   :  { %360 = vst.msk [vmem:[%s636_s1 + $0x40] sm:$0xff] %vm350_vm3, %v330_v50  ;;  %v332_v60 = vmul.f32 0.11111111, %v304_v51  ;;  %v333_v61 = vmul.f32 0.11111111, %v305_v52  ;;  %v144_v62 = vrot.slane %v81_v53, 1  ;;  %v56_v9 = vadd.f32 %v26_v54, %v24_v36 }
  0x1e   :  { %v243_v63 = vrot.slane %v81_v53, 2  ;;  %v146_v0 = vrot.slane %v82_v58, 1  ;;  %v147_v1 = vrot.slane %v83_v59, 1  ;;  %v245_v2 = vrot.slane %v82_v58, 2 }
  0x1f   :  { %v246_v3 = vrot.slane %v83_v59, 2  ;;  %362 = vst.msk [vmem:[%s636_s1 + $0x50] sm:$0xff] %vm350_vm3, %v332_v60  ;;  %v145_v4 = vsel %vm124_vm0, %v143_v56, %v144_v62  ;;  %v208_v6 = vadd.f32 %v144_v62, %v81_v53  ;;  %v57_v12 = vadd.f32 %v27_v55, %v25_v37 }
  0x20   :  { %363 = vst.msk [vmem:[%s636_s1 + $0x58] sm:$0x3f] %vm352_vm2, %v333_v61  ;;  %v244_v5 = vsel %vm223_vm1, %v242_v57, %v243_v63  ;;  %v207_v10 = vadd.f32 %v145_v4, %v80_v45  ;;  %v148_v11 = vsel %vm124_vm0, %v146_v0, %v147_v1  ;;  %v210_v15 = vadd.f32 %v147_v1, %v83_v59  ;;  %v33_v45 = vld [vmem:[%s635_s0 + $0xc8] sm:$0xff]  ;;  %v34_v1 = vld [vmem:[%s635_s0 + $0xd0] sm:$0xff] }
  0x21   :  { %v247_v13 = vsel %vm223_vm1, %v245_v2, %v246_v3  ;;  %v307_v16 = vadd.f32 %v243_v63, %v208_v6  ;;  %v209_v17 = vadd.f32 %v148_v11, %v82_v58  ;;  %v84_v14 = vadd.f32 %v56_v9, %v28_v7  ;;  %v35_v6 = vld [vmem:[%s635_s0 + $0xd8] sm:$0xff] }
  0x22   :  { %v306_v18 = vadd.f32 %v244_v5, %v207_v10  ;;  %v309_v19 = vadd.f32 %v246_v3, %v210_v15  ;;  %v58_v20 = vadd.f32 %v28_v7, %v26_v54  ;;  %v59_v21 = vadd.f32 %v29_v8, %v27_v55  ;;  %v37_v15 = vld [vmem:[%s635_s0 + $0xe8] sm:$0xff] }
  0x23   :  { %v335_v22 = vmul.f32 0.11111111, %v307_v16  ;;  %v308_v23 = vadd.f32 %v247_v13, %v209_v17  ;;  %v85_v24 = vadd.f32 %v57_v12, %v29_v8  ;;  %v149_v25 = vrot.slane %v84_v14, 1  ;;  %v36_v13 = vld [vmem:[%s635_s0 + $0xe0] sm:$0xff] }
  0x24   :  { %v334_v28 = vmul.f32 0.11111111, %v306_v18  ;;  %v337_v29 = vmul.f32 0.11111111, %v309_v19  ;;  %v248_v30 = vrot.slane %v84_v14, 2  ;;  %v86_v31 = vadd.f32 %v58_v20, %v30_v26 }
  0x25   :  { %365 = vst.msk [vmem:[%s636_s1 + $0x68] sm:$0x3f] %vm352_vm2, %v335_v22  ;;  %v336_v32 = vmul.f32 0.11111111, %v308_v23  ;;  %v150_v33 = vrot.slane %v85_v24, 1  ;;  %v249_v34 = vrot.slane %v85_v24, 2  ;;  %v87_v35 = vadd.f32 %v59_v21, %v31_v27 }
  0x26   :  { %364 = vst.msk [vmem:[%s636_s1 + $0x60] sm:$0xff] %vm350_vm3, %v334_v28  ;;  %v152_v36 = vrot.slane %v86_v31, 1  ;;  %v251_v37 = vrot.slane %v86_v31, 2  ;;  %v60_v39 = vadd.f32 %v30_v26, %v28_v7  ;;  %v61_v40 = vadd.f32 %v31_v27, %v29_v8 }
  0x27   :  { %367 = vst.msk [vmem:[%s636_s1 + $0x78] sm:$0x3f] %vm352_vm2, %v337_v29  ;;  %v151_v41 = vsel %vm124_vm0, %v149_v25, %v150_v33  ;;  %v250_v42 = vsel %vm223_vm1, %v248_v30, %v249_v34  ;;  %v212_v43 = vadd.f32 %v150_v33, %v85_v24  ;;  %v153_v44 = vrot.slane %v87_v35, 1  ;;  %v38_v24 = vld [vmem:[%s635_s0 + $0xf0] sm:$0xff]  ;;  %v39_v25 = vld [vmem:[%s635_s0 + $0xf8] sm:$0xff] }
  0x28   :  { %366 = vst.msk [vmem:[%s636_s1 + $0x70] sm:$0xff] %vm350_vm3, %v336_v32  ;;  %v211_v46 = vadd.f32 %v151_v41, %v84_v14  ;;  %v252_v47 = vrot.slane %v87_v35, 2  ;;  %v88_v48 = vadd.f32 %v60_v39, %v32_v38  ;;  %v89_v49 = vadd.f32 %v61_v40, %v33_v45 }
  0x29   :  { %v311_v50 = vadd.f32 %v249_v34, %v212_v43  ;;  %v154_v51 = vsel %vm124_vm0, %v152_v36, %v153_v44  ;;  %v214_v52 = vadd.f32 %v153_v44, %v87_v35  ;;  %v62_v53 = vadd.f32 %v32_v38, %v30_v26 }
  0x2a   :  { %v310_v54 = vadd.f32 %v250_v42, %v211_v46  ;;  %v213_v55 = vadd.f32 %v154_v51, %v86_v31  ;;  %v253_v56 = vsel %vm223_vm1, %v251_v37, %v252_v47  ;;  %v155_v57 = vrot.slane %v88_v48, 1 }
  0x2b   :  { %v339_v58 = vmul.f32 0.11111111, %v311_v50  ;;  %v313_v59 = vadd.f32 %v252_v47, %v214_v52  ;;  %v156_v60 = vrot.slane %v89_v49, 1  ;;  %v254_v61 = vrot.slane %v88_v48, 2 }
  0x2c   :  { %v338_v62 = vmul.f32 0.11111111, %v310_v54  ;;  %v312_v63 = vadd.f32 %v253_v56, %v213_v55  ;;  %v255_v0 = vrot.slane %v89_v49, 2  ;;  %v63_v2 = vadd.f32 %v33_v45, %v31_v27 }
  0x2d   :  { %369 = vst.msk [vmem:[%s636_s1 + $0x88] sm:$0x3f] %vm352_vm2, %v339_v58  ;;  %v341_v3 = vmul.f32 0.11111111, %v313_v59  ;;  %v157_v4 = vsel %vm124_vm0, %v155_v57, %v156_v60  ;;  %v216_v5 = vadd.f32 %v156_v60, %v89_v49  ;;  %v90_v7 = vadd.f32 %v62_v53, %v34_v1 }
  0x2e   :  { %368 = vst.msk [vmem:[%s636_s1 + $0x80] sm:$0xff] %vm350_vm3, %v338_v62  ;;  %v340_v8 = vmul.f32 0.11111111, %v312_v63  ;;  %v215_v9 = vadd.f32 %v157_v4, %v88_v48  ;;  %v256_v10 = vsel %vm223_vm1, %v254_v61, %v255_v0  ;;  %v91_v11 = vadd.f32 %v63_v2, %v35_v6 }
  0x2f   :  { %371 = vst.msk [vmem:[%s636_s1 + $0x98] sm:$0x3f] %vm352_vm2, %v341_v3  ;;  %v315_v16 = vadd.f32 %v255_v0, %v216_v5  ;;  %v158_v17 = vrot.slane %v90_v7, 1  ;;  %v257_v12 = vrot.slane %v90_v7, 2  ;;  %v64_v14 = vadd.f32 %v34_v1, %v32_v38 }
  0x30   :  { %370 = vst.msk [vmem:[%s636_s1 + $0x90] sm:$0xff] %vm350_vm3, %v340_v8  ;;  %v314_v18 = vadd.f32 %v256_v10, %v215_v9  ;;  %v159_v19 = vrot.slane %v91_v11, 1  ;;  %v258_v20 = vrot.slane %v91_v11, 2  ;;  %v65_v21 = vadd.f32 %v35_v6, %v33_v45 }
  0x31   :  { %v343_v22 = vmul.f32 0.11111111, %v315_v16  ;;  %v92_v23 = vadd.f32 %v64_v14, %v36_v13  ;;  %v66_v26 = vadd.f32 %v36_v13, %v34_v1  ;;  %v67_v27 = vadd.f32 %v37_v15, %v35_v6 }
  0x32   :  { %v342_v28 = vmul.f32 0.11111111, %v314_v18  ;;  %v160_v29 = vsel %vm124_vm0, %v158_v17, %v159_v19  ;;  %v259_v30 = vsel %vm223_vm1, %v257_v12, %v258_v20  ;;  %v218_v31 = vadd.f32 %v159_v19, %v91_v11 }
  0x33   :  { %373 = vst.msk [vmem:[%s636_s1 + $0xa8] sm:$0x3f] %vm352_vm2, %v343_v22  ;;  %v217_v32 = vadd.f32 %v160_v29, %v90_v7  ;;  %v93_v33 = vadd.f32 %v65_v21, %v37_v15  ;;  %v161_v34 = vrot.slane %v92_v23, 1  ;;  %v260_v35 = vrot.slane %v92_v23, 2 }
  0x34   :  { %372 = vst.msk [vmem:[%s636_s1 + $0xa0] sm:$0xff] %vm350_vm3, %v342_v28  ;;  %v317_v36 = vadd.f32 %v258_v20, %v218_v31  ;;  %v94_v37 = vadd.f32 %v66_v26, %v38_v24  ;;  %v95_v38 = vadd.f32 %v67_v27, %v39_v25 }
  0x35   :  { %v316_v39 = vadd.f32 %v259_v30, %v217_v32  ;;  %v162_v40 = vrot.slane %v93_v33, 1  ;;  %v261_v41 = vrot.slane %v93_v33, 2 }
  0x36   :  { %v345_v42 = vmul.f32 0.11111111, %v317_v36  ;;  %v164_v43 = vrot.slane %v94_v37, 1  ;;  %v165_v44 = vrot.slane %v95_v38, 1  ;;  %v263_v45 = vrot.slane %v94_v37, 2 }
  0x37   :  { %v344_v46 = vmul.f32 0.11111111, %v316_v39  ;;  %v163_v47 = vsel %vm124_vm0, %v161_v34, %v162_v40  ;;  %v262_v48 = vsel %vm223_vm1, %v260_v35, %v261_v41  ;;  %v220_v49 = vadd.f32 %v162_v40, %v93_v33 }
  0x38   :  { %375 = vst.msk [vmem:[%s636_s1 + $0xb8] sm:$0x3f] %vm352_vm2, %v345_v42  ;;  %v219_v50 = vadd.f32 %v163_v47, %v92_v23  ;;  %v166_v51 = vsel %vm124_vm0, %v164_v43, %v165_v44  ;;  %v264_v52 = vrot.slane %v95_v38, 2  ;;  %v222_v53 = vadd.f32 %v165_v44, %v95_v38 }
  0x39   :  { %374 = vst.msk [vmem:[%s636_s1 + $0xb0] sm:$0xff] %vm350_vm3, %v344_v46  ;;  %v319_v54 = vadd.f32 %v261_v41, %v220_v49  ;;  %v221_v55 = vadd.f32 %v166_v51, %v94_v37 }
  0x3a   :  { %v318_v56 = vadd.f32 %v262_v48, %v219_v50  ;;  %v265_v57 = vsel %vm223_vm1, %v263_v45, %v264_v52  ;;  %v321_v58 = vadd.f32 %v264_v52, %v222_v53 }
  0x3b   :  { %v347_v59 = vmul.f32 0.11111111, %v319_v54  ;;  %v320_v60 = vadd.f32 %v265_v57, %v221_v55 }
  0x3c   :  { %v346_v61 = vmul.f32 0.11111111, %v318_v56  ;;  %v349_v62 = vmul.f32 0.11111111, %v321_v58 }
  0x3d   :  { %377 = vst.msk [vmem:[%s636_s1 + $0xc8] sm:$0x3f] %vm352_vm2, %v347_v59  ;;  %v348_v63 = vmul.f32 0.11111111, %v320_v60 }
  0x3e   :  { %376 = vst.msk [vmem:[%s636_s1 + $0xc0] sm:$0xff] %vm350_vm3, %v346_v61 }
  0x3f   :  { %379 = vst.msk [vmem:[%s636_s1 + $0xd8] sm:$0x3f] %vm352_vm2, %v349_v62 }
  0x40   :  { %378 = vst.msk [vmem:[%s636_s1 + $0xd0] sm:$0xff] %vm350_vm3, %v348_v63 }

</bundles_post_ra>
